<compile_context>
chip_gen: v7x
topology: tpu7x:2x2x1
jax: 0.10.0
libtpu: 0.0.40
codegen_flags: <defaults>
</compile_context>

<pallas_src>
import functools

import jax
import jax.numpy as jnp
from jax import lax
from jax.experimental import pallas as pl
from jax.experimental.pallas import tpu as pltpu


def _round_up(x, m):
    return ((x + m - 1) // m) * m


def _cdiv(a, b):
    return -(-a // b)


def _vmem_budget_bytes():
    """Usable VMEM budget for this chip generation (leaves headroom)."""
    try:
        cap = int(pltpu.get_tpu_info().vmem_capacity_bytes)
    except Exception:          # no info available -> assume smallest (v7x-class)
        cap = 64 << 20
    # ~48 MiB on v7x (64 MiB physical), ~96 MiB on v5e/v6e (128 MiB physical).
    return min((cap * 3) // 4, 96 << 20)


def _focal_rows(logits, tgt, alpha, row_start, *, gamma, n_total, use_alpha):
    """Per-row focal loss for one (TM, C) tile -> (TM, 1) f32 column.

    Rows past the true batch size are masked to 0 with a select, so padded
    garbage logits that went through exp/log never propagate NaN/Inf.
    """
    logits = logits.astype(jnp.float32)                      # (TM, C)
    tm, c = logits.shape

    # Stable log-softmax pieces, computed once and reused.
    m = jnp.max(logits, axis=-1, keepdims=True)              # (TM, 1)
    shifted = logits - m                                      # (TM, C)
    p = jnp.exp(shifted)                                      # (TM, C)  (EUP)
    s = jnp.sum(p, axis=-1, keepdims=True)                    # (TM, 1)

    cls_idx = lax.broadcasted_iota(jnp.int32, (tm, c), 1)     # (TM, C)
    onehot = cls_idx == tgt                                    # (TM, C)
    sel_shift = jnp.sum(jnp.where(onehot, shifted, 0.0), axis=-1, keepdims=True)
    sel_p = jnp.sum(jnp.where(onehot, p, 0.0), axis=-1, keepdims=True)

    # ce = logsumexp - logit[target];  pt = exp(-ce) reusing p (no extra exp).
    ce = jnp.log(s) - sel_shift                                # (TM, 1), >= 0
    pt = sel_p * pl.reciprocal(s, approx=False)                # (TM, 1)

    # (1 - pt)^gamma: clamp base >= 0 (fp rounding can give pt > 1); integer
    # gamma (the default 2.0) becomes repeated multiplies (no pow chain).
    one_minus_pt = jnp.maximum(1.0 - pt, 0.0)
    g = float(gamma)
    if g == int(g) and 0 <= int(g) <= 8:
        w = jnp.ones_like(one_minus_pt)
        for _ in range(int(g)):
            w = w * one_minus_pt
    else:
        w = one_minus_pt ** g
    focal = w * ce                                             # (TM, 1)

    if use_alpha:
        alpha_t = jnp.sum(jnp.where(onehot, alpha.astype(jnp.float32), 0.0),
                          axis=-1, keepdims=True)
        focal = alpha_t * focal

    # Mask rows beyond the true batch.  Keep this a select (NOT a multiply).
    row = row_start + lax.broadcasted_iota(jnp.int32, (tm, 1), 0)
    return jnp.where(row < n_total, focal, 0.0)


def _focal_reduce_kernel(logits_ref, tgt_ref, alpha_ref, out_ref, *,
                         gamma, n_total, use_alpha, tiles_per_core):
    """mean/sum path.  Grid = (num_cores[parallel], tiles_per_core[arbitrary])."""
    tm = logits_ref.shape[0]
    tile = pl.program_id(0) * tiles_per_core + pl.program_id(1)
    focal = _focal_rows(logits_ref[...], tgt_ref[...], alpha_ref[...],
                        tile * tm, gamma=gamma, n_total=n_total,
                        use_alpha=use_alpha)

    @pl.when(pl.program_id(1) == 0)
    def _init():
        out_ref[...] = jnp.zeros_like(out_ref)

    # Resident per-core (1,1,1) accumulator: constant block index along the
    # "arbitrary" batch axis, distinct block per "parallel" core.
    out_ref[...] += jnp.sum(focal, axis=0, keepdims=True).reshape(1, 1, 1)


def _focal_none_kernel(logits_ref, tgt_ref, alpha_ref, out_ref, *,
                       gamma, n_total, use_alpha, col_out):
    """reduction='none' path.  Grid = (num_tiles[parallel],)."""
    tm = logits_ref.shape[0]
    focal = _focal_rows(logits_ref[...], tgt_ref[...], alpha_ref[...],
                        pl.program_id(0) * tm, gamma=gamma, n_total=n_total,
                        use_alpha=use_alpha)
    if col_out:
        out_ref[...] = focal                       # (TM, 1) column block
    else:
        out_ref[0] = jnp.transpose(focal)          # (TM,1)->(1,TM): one vxpose


def focal_loss(inputs, targets, alpha=None, gamma=2.0, reduction="mean",
               tile_rows=None):
    """Pallas implementation of FocalLoss.forward.

    inputs:    (N, C) float logits (f32 or bf16 — kept in wire dtype on HBM)
    targets:   (N,)   int class indices
    alpha:     optional (C,) float class weights (None -> no weighting)
    tile_rows: optional rows-per-tile override (testing / tuning).
    """
    n, c = inputs.shape
    use_alpha = alpha is not None
    alpha_arr = (jnp.asarray(alpha, jnp.float32).reshape(1, c) if use_alpha
                 else jnp.ones((1, c), jnp.float32))       # unused when None
    tgt = targets.astype(jnp.int32).reshape(n, 1)

    itemsize = jnp.dtype(inputs.dtype).itemsize
    granule = max(8, 32 // itemsize)       # f32: 8, bf16: 16, int8/fp8: 32
    lane = _round_up(max(c, 1), 128)       # VMEM lane padding of the class axis

    # ---- bytes-based tile sizing (review item 1/4/6) -----------------------
    budget = _vmem_budget_bytes()
    # Lane-padded VMEM bytes per logits row: double-buffered logits (wire
    # dtype) + double-buffered (TM,1) int32 targets (padded to 128 lanes) +
    # ~8 live f32 (TM, lane) intermediates inside the kernel body.
    per_row = 2 * lane * itemsize + 2 * 128 * 4 + 8 * lane * 4
    # ~2 MiB lane-padded logits per buffer on 64-MiB-VMEM parts (v7x), ~4 MiB
    # on 128-MiB parts (v5e/v6e); clamp so the whole working set stays in VMEM.
    tile_target = (2 << 20) if budget < (64 << 20) else (4 << 20)
    tm_budget = min(tile_target // (lane * itemsize),
                    max(granule, (budget - (4 << 20)) // per_row))
    if tile_rows is not None:
        tm_budget = max(granule, int(tile_rows))

    if tm_budget >= n:
        tm, num_tiles = n, 1               # single block covering all rows
    else:
        tm = max(granule, (tm_budget // granule) * granule)
        num_tiles = _cdiv(n, tm)
    vmem_limit = int(min(budget, max(32 << 20, tm * per_row + (4 << 20))))

    if reduction in ("mean", "sum"):
        # ---- v7x megacore split (review item 3) ----------------------------
        # Leading "parallel" axis over (up to) 2 cores; each core accumulates
        # into its own block.  Rank-3 output so the *last two* block dims equal
        # the array dims (keeps the (8,128) block-shape rule satisfied).
        num_cores = 2 if num_tiles > 1 else 1
        tiles_per_core = _cdiv(num_tiles, num_cores)
        last_tile = num_tiles - 1

        def in_idx(ci, ti):
            # Clamp the (core, step)->tile map for the duplicate tail tile when
            # num_tiles is odd; its rows are fully masked inside the kernel.
            return (jnp.minimum(ci * tiles_per_core + ti, last_tile), 0)

        kernel = functools.partial(
            _focal_reduce_kernel, gamma=float(gamma), n_total=n,
            use_alpha=use_alpha, tiles_per_core=tiles_per_core)

        partials = pl.pallas_call(
            kernel,
            out_shape=jax.ShapeDtypeStruct((num_cores, 1, 1), jnp.float32),
            grid_spec=pltpu.PrefetchScalarGridSpec(
                num_scalar_prefetch=0,
                grid=(num_cores, tiles_per_core),
                in_specs=[
                    pl.BlockSpec((tm, c), in_idx),                # logits tile
                    pl.BlockSpec((tm, 1), in_idx),                # targets tile
                    pl.BlockSpec((1, c), lambda ci, ti: (0, 0)),  # alpha (resident)
                ],
                out_specs=pl.BlockSpec((1, 1, 1), lambda ci, ti: (ci, 0, 0)),
            ),
            compiler_params=pltpu.CompilerParams(
                dimension_semantics=("parallel", "arbitrary"),
                vmem_limit_bytes=vmem_limit,
            ),
        )(inputs, tgt, alpha_arr)

        total = jnp.sum(partials)
        return total / n if reduction == "mean" else total

    if reduction == "none":
        def run(col_out):
            if col_out:
                out_shape = jax.ShapeDtypeStruct((num_tiles * tm, 1), jnp.float32)
                out_spec = pl.BlockSpec((tm, 1), lambda i: (i, 0))
            else:
                # Lane-dense: one (1, TM) row per tile, single full-width store.
                out_shape = jax.ShapeDtypeStruct((num_tiles, 1, tm), jnp.float32)
                out_spec = pl.BlockSpec((1, 1, tm), lambda i: (i, 0, 0))
            kernel = functools.partial(
                _focal_none_kernel, gamma=float(gamma), n_total=n,
                use_alpha=use_alpha, col_out=col_out)
            return pl.pallas_call(
                kernel,
                out_shape=out_shape,
                grid_spec=pltpu.PrefetchScalarGridSpec(
                    num_scalar_prefetch=0,
                    grid=(num_tiles,),
                    in_specs=[
                        pl.BlockSpec((tm, c), lambda i: (i, 0)),
                        pl.BlockSpec((tm, 1), lambda i: (i, 0)),
                        pl.BlockSpec((1, c), lambda i: (0, 0)),
                    ],
                    out_specs=out_spec,
                ),
                compiler_params=pltpu.CompilerParams(
                    dimension_semantics=("parallel",),
                    vmem_limit_bytes=vmem_limit,
                ),
            )(inputs, tgt, alpha_arr)

        try:
            out = run(col_out=False)
        except Exception:
            # TODO(synk): drop this fallback once the (K,1)->(1,K) transpose
            # lowering is guaranteed on every deployed Mosaic version.
            out = run(col_out=True)
        return out.reshape(-1)[:n]

    raise ValueError(f"unsupported reduction: {reduction!r}")


if __name__ == "__main__":
    key = jax.random.PRNGKey(0)
    k1, k2, k3, k4 = jax.random.split(key, 4)

    def ref_focal(logits, targets, alpha=None, gamma=2.0, reduction="mean"):
        logits = logits.astype(jnp.float32)
        lse = jax.nn.logsumexp(logits, axis=-1)
        ce = lse - logits[jnp.arange(logits.shape[0]), targets]
        pt = jnp.exp(-ce)
        fl = (1.0 - pt) ** gamma * ce
        if alpha is not None:
            fl = alpha[targets] * fl
        if reduction == "mean":
            return jnp.mean(fl)
        if reduction == "sum":
            return jnp.sum(fl)
        return fl

    # Small shapes consistent with the module (per-utterance emotion logits).
    N, C = 8, 16
    logits = jax.random.normal(k1, (N, C), dtype=jnp.float32)
    targets = jax.random.randint(k2, (N,), 0, C, dtype=jnp.int32)
    alpha = jax.random.uniform(k3, (C,), jnp.float32, minval=0.25, maxval=1.0)

    # 1) Module defaults: alpha=None, gamma=2.0, reduction='mean'.
    out_mean = focal_loss(logits, targets)
    jax.block_until_ready(out_mean)
    assert jnp.allclose(out_mean, ref_focal(logits, targets), rtol=1e-5, atol=1e-5)

    # 2) 'sum' reduction.
    out_sum = focal_loss(logits, targets, reduction="sum")
    assert jnp.allclose(out_sum, ref_focal(logits, targets, reduction="sum"),
                        rtol=1e-5, atol=1e-5)

    # 3) alpha weighting + reduction='none' (lane-dense row output).
    out_none = focal_loss(logits, targets, alpha=alpha, reduction="none")
    assert out_none.shape == (N,)
    assert jnp.allclose(out_none, ref_focal(logits, targets, alpha, 2.0, "none"),
                        rtol=1e-5, atol=1e-5)

    # 4) Ragged batch: default (single-tile) sizing and forced multi-tile
    #    sizing — exercises the per-core resident accumulators, the clamped
    #    duplicate tail tile on the second "core", and partial-block masking.
    N2 = 1030
    logits2 = jax.random.normal(k4, (N2, C), dtype=jnp.float32)
    targets2 = jax.random.randint(k2, (N2,), 0, C, dtype=jnp.int32)
    ref2 = ref_focal(logits2, targets2)
    out2a = focal_loss(logits2, targets2)
    out2b = focal_loss(logits2, targets2, tile_rows=256)
    assert jnp.allclose(out2a, ref2, rtol=1e-4, atol=1e-4)
    assert jnp.allclose(out2b, ref2, rtol=1e-4, atol=1e-4)

    # 5) Multi-tile 'none' with alpha (one lane-dense row store per tile).
    out3 = focal_loss(logits2, targets2, alpha=alpha, reduction="none",
                      tile_rows=256)
    assert out3.shape == (N2,)
    assert jnp.allclose(out3, ref_focal(logits2, targets2, alpha, 2.0, "none"),
                        rtol=1e-4, atol=1e-4)

    # 6) bf16 logits stay bf16 on the wire (TM granule rounds to 16).
    out_bf16 = focal_loss(logits.astype(jnp.bfloat16), targets)
    assert jnp.allclose(out_bf16,
                        ref_focal(logits.astype(jnp.bfloat16), targets),
                        rtol=1e-2, atol=1e-2)

    jax.block_until_ready(out_bf16)
    print("KERNEL_OK")
</pallas_src>

<mosaic_0001>
module attributes {stable_mosaic.version = 11 : i64} {
  func.func @_focal_reduce_kernel(%arg0: i32, %arg1: i32, %arg2: memref<8x16xf32, #tpu.memory_space<vmem>>, %arg3: memref<8x1xi32, #tpu.memory_space<vmem>>, %arg4: memref<1x16xf32, #tpu.memory_space<vmem>>, %arg5: memref<1x1x1xf32, #tpu.memory_space<vmem>>) attributes {dimension_semantics = [#tpu.dimension_semantics<parallel>, #tpu.dimension_semantics<arbitrary>], iteration_bounds = array<i64: 1, 1>, scalar_prefetch = 0 : i64, scratch_operands = 0 : i64, tpu.core_type = #tpu.core_type<tc>, window_params = [{transform_indices = @transform_0, window_bounds = array<i64: 8, 16>}, {transform_indices = @transform_1, window_bounds = array<i64: 8, 1>}, {pipeline_mode = #tpu.pipeline_mode<synchronous>, transform_indices = @transform_2, window_bounds = array<i64: 1, 16>}, {transform_indices = @transform_3, window_bounds = array<i64: 1, 1, 1>}]} {
    %c1_i32 = arith.constant 1 : i32
    %0 = arith.muli %arg0, %c1_i32 : i32
    %1 = arith.addi %0, %arg1 : i32
    %c0 = arith.constant 0 : index
    %c0_0 = arith.constant 0 : index
    %2 = vector.load %arg2[%c0, %c0_0] : memref<8x16xf32, #tpu.memory_space<vmem>>, vector<8x16xf32>
    %c0_1 = arith.constant 0 : index
    %c0_2 = arith.constant 0 : index
    %3 = vector.load %arg3[%c0_1, %c0_2] : memref<8x1xi32, #tpu.memory_space<vmem>>, vector<8x1xi32>
    %c8_i32 = arith.constant 8 : i32
    %4 = arith.muli %1, %c8_i32 : i32
    %cst = arith.constant dense<0xFF800000> : vector<8xf32>
    %5 = vector.multi_reduction <maximumf>, %2, %cst [1] : vector<8x16xf32> to vector<8xf32>
    %6 = vector.shape_cast %5 : vector<8xf32> to vector<8x1xf32>
    %7 = vector.broadcast %6 : vector<8x1xf32> to vector<8x16xf32>
    %8 = arith.subf %2, %7 : vector<8x16xf32>
    %9 = math.exp %8 : vector<8x16xf32>
    %cst_3 = arith.constant dense<0.000000e+00> : vector<8xf32>
    %10 = vector.multi_reduction <add>, %9, %cst_3 [1] : vector<8x16xf32> to vector<8xf32>
    %11 = vector.shape_cast %10 : vector<8xf32> to vector<8x1xf32>
    %12 = tpu.iota {dimensions = array<i32: 1>} : vector<8x16xi32>
    %13 = vector.broadcast %3 : vector<8x1xi32> to vector<8x16xi32>
    %14 = arith.cmpi eq, %12, %13 : vector<8x16xi32>
    %cst_4 = arith.constant 0.000000e+00 : f32
    %15 = vector.broadcast %cst_4 : f32 to vector<8x16xf32>
    %16 = arith.select %14, %8, %15 : vector<8x16xi1>, vector<8x16xf32>
    %cst_5 = arith.constant dense<0.000000e+00> : vector<8xf32>
    %17 = vector.multi_reduction <add>, %16, %cst_5 [1] : vector<8x16xf32> to vector<8xf32>
    %18 = vector.shape_cast %17 : vector<8xf32> to vector<8x1xf32>
    %cst_6 = arith.constant 0.000000e+00 : f32
    %19 = vector.broadcast %cst_6 : f32 to vector<8x16xf32>
    %20 = arith.select %14, %9, %19 : vector<8x16xi1>, vector<8x16xf32>
    %cst_7 = arith.constant dense<0.000000e+00> : vector<8xf32>
    %21 = vector.multi_reduction <add>, %20, %cst_7 [1] : vector<8x16xf32> to vector<8xf32>
    %22 = vector.shape_cast %21 : vector<8xf32> to vector<8x1xf32>
    %23 = math.log %11 : vector<8x1xf32>
    %24 = arith.subf %23, %18 : vector<8x1xf32>
    %25 = tpu.reciprocal %11 : vector<8x1xf32> -> vector<8x1xf32>
    %26 = arith.mulf %22, %25 : vector<8x1xf32>
    %cst_8 = arith.constant 1.000000e+00 : f32
    %27 = vector.broadcast %cst_8 : f32 to vector<8x1xf32>
    %28 = arith.subf %27, %26 : vector<8x1xf32>
    %cst_9 = arith.constant 0.000000e+00 : f32
    %29 = vector.broadcast %cst_9 : f32 to vector<8x1xf32>
    %30 = arith.maximumf %28, %29 : vector<8x1xf32>
    %cst_10 = arith.constant 1.000000e+00 : f32
    %31 = vector.broadcast %cst_10 : f32 to vector<8x1xf32>
    %32 = arith.mulf %31, %30 : vector<8x1xf32>
    %33 = arith.mulf %32, %30 : vector<8x1xf32>
    %34 = arith.mulf %33, %24 : vector<8x1xf32>
    %35 = tpu.iota {dimensions = array<i32: 0>} : vector<8x1xi32>
    %36 = vector.broadcast %4 : i32 to vector<8x1xi32>
    %37 = arith.addi %36, %35 : vector<8x1xi32>
    %c8_i32_11 = arith.constant 8 : i32
    %38 = vector.broadcast %c8_i32_11 : i32 to vector<8x1xi32>
    %39 = arith.cmpi slt, %37, %38 : vector<8x1xi32>
    %cst_12 = arith.constant 0.000000e+00 : f32
    %40 = vector.broadcast %cst_12 : f32 to vector<8x1xf32>
    %41 = arith.select %39, %34, %40 : vector<8x1xi1>, vector<8x1xf32>
    %c0_i32 = arith.constant 0 : i32
    %42 = arith.cmpi eq, %arg1, %c0_i32 : i32
    %43 = arith.extui %42 : i1 to i32
    %c0_i32_13 = arith.constant 0 : i32
    %44 = arith.cmpi ne, %43, %c0_i32_13 : i32
    scf.if %44 {
      %cst_21 = arith.constant 0.000000e+00 : f32
      %51 = vector.broadcast %cst_21 : f32 to vector<1x1x1xf32>
      %c0_22 = arith.constant 0 : index
      %c0_23 = arith.constant 0 : index
      %c0_24 = arith.constant 0 : index
      %52 = vector.load %arg5[%c0_22, %c0_23, %c0_24] : memref<1x1x1xf32, #tpu.memory_space<vmem>>, vector<1x1x1xf32>
      tpu.vector_store %arg5[%c0_22, %c0_23, %c0_24], %51 {strides = array<i32>} : memref<1x1x1xf32, #tpu.memory_space<vmem>>, vector<1x1x1xf32>,
    } else {
    }
    %c0_14 = arith.constant 0 : index
    %c0_15 = arith.constant 0 : index
    %c0_16 = arith.constant 0 : index
    %45 = vector.load %arg5[%c0_14, %c0_15, %c0_16] : memref<1x1x1xf32, #tpu.memory_space<vmem>>, vector<1x1x1xf32>
    %cst_17 = arith.constant dense<0.000000e+00> : vector<1xf32>
    %46 = vector.multi_reduction <add>, %41, %cst_17 [0] : vector<8x1xf32> to vector<1xf32>
    %47 = vector.shape_cast %46 : vector<1xf32> to vector<1x1xf32>
    %48 = vector.shape_cast %47 : vector<1x1xf32> to vector<1x1x1xf32>
    %49 = arith.addf %45, %48 : vector<1x1x1xf32>
    %c0_18 = arith.constant 0 : index
    %c0_19 = arith.constant 0 : index
    %c0_20 = arith.constant 0 : index
    %50 = vector.load %arg5[%c0_18, %c0_19, %c0_20] : memref<1x1x1xf32, #tpu.memory_space<vmem>>, vector<1x1x1xf32>
    tpu.vector_store %arg5[%c0_18, %c0_19, %c0_20], %49 {strides = array<i32>} : memref<1x1x1xf32, #tpu.memory_space<vmem>>, vector<1x1x1xf32>,
    return
  }
  func.func @transform_0(%arg0: i32, %arg1: i32) -> (i32, i32) {
    %c1_i32 = arith.constant 1 : i32
    %0 = arith.muli %arg0, %c1_i32 : i32
    %1 = arith.addi %0, %arg1 : i32
    %c0_i32 = arith.constant 0 : i32
    %2 = arith.minsi %1, %c0_i32 : i32
    %c0_i32_0 = arith.constant 0 : i32
    %c0_i32_1 = arith.constant 0 : i32
    return %2, %c0_i32_0 : i32, i32
  }
  func.func @transform_1(%arg0: i32, %arg1: i32) -> (i32, i32) {
    %c1_i32 = arith.constant 1 : i32
    %0 = arith.muli %arg0, %c1_i32 : i32
    %1 = arith.addi %0, %arg1 : i32
    %c0_i32 = arith.constant 0 : i32
    %2 = arith.minsi %1, %c0_i32 : i32
    %c0_i32_0 = arith.constant 0 : i32
    %c0_i32_1 = arith.constant 0 : i32
    return %2, %c0_i32_0 : i32, i32
  }
  func.func @transform_2(%arg0: i32, %arg1: i32) -> (i32, i32) {
    %c0_i32 = arith.constant 0 : i32
    %c0_i32_0 = arith.constant 0 : i32
    %c0_i32_1 = arith.constant 0 : i32
    return %c0_i32, %c0_i32_0 : i32, i32
  }
  func.func @transform_3(%arg0: i32, %arg1: i32) -> (i32, i32, i32) {
    %c0_i32 = arith.constant 0 : i32
    %c0_i32_0 = arith.constant 0 : i32
    %c0_i32_1 = arith.constant 0 : i32
    return %arg0, %c0_i32, %c0_i32_0 : i32, i32, i32
  }
}

</mosaic_0001>

<bundles_post_ra>
// kernel: tpu_custom_call.1
= control target key start
LH: loop header
LB: loop body
LE: loop exit
PB: predicated region body
PF: predicated region fallthrough
CT: control target
= control target key end

     0   :  { %vm73_vm0 = vcmask 130048   ;;  %s235_s0 = inlined_call_operand.vmem [shape: f32[8,16], index: 0, kind: input, shape index: {}]   ;;  %s236_s1 = inlined_call_operand.vmem [shape: s32[8,1], index: 1, kind: input, shape index: {}]   ;;  %s237_s2 = inlined_call_operand.vmem [shape: f32[1,16], index: 2, kind: input, shape index: {}]   ;;  %s238_s3 = inlined_call_operand.hbm [shape: f32[1,1,1], index: 3, kind: output, shape index: {}]  }
   0x1   :  { %v70_v0 = vld [vmem:[%s235_s0] sm:$0xff] }
   0x2   :  { %8 = vsyncpa [#allocation3], 0  ;;  %v74_v1 = vsel %vm73_vm0, %v70_v0, -inf  ;;  %v188_v2 = vmov 0   ;;  %v71_v3 = vld [vmem:[%s236_s1] sm:$0xff]  ;;  %v83_v7 = vlaneseq  ;;  %vm116_vm2 = vcmask 0  }
   0x3   :  { %157 = vset.pattern.permute.xlu0 %v188_v2  ;;  %v189_v16 = vmov 0.0   ;;  %s190_s0 = smov [#allocation2]  }
   0x4   :  { %75 = vmax.xlane.f32.xlu0 %v74_v1  ;;  %v84_v8 = vand.u32 127, %v83_v7  ;;  %117 = vst.msk [vmem:[#allocation2] sm:$0x1] %vm116_vm2, %v189_v16  ;;  %s134_s1 = sshll.u32 %s190_s0, 4  ;;  %s135_s1 = int_to_ptr.vmem [resolvable:$true] %s134_s1 }
   0x5   :  { %s164_s2 = scalar_lea.vmem %s135_s1, 16  ;;  %s168_s16 = scalar_lea.vmem %s135_s1, 32 }
   0x6   :  { %p165_p0 = scmp.ne.s32.totalorder %s135_s1, %s164_s2  ;;  %p169_p1 = scmp.lt.s32.totalorder %s135_s1, %s135_s1 }
   0x7   :  { %p170_p2 = scmp.lt.s32.totalorder %s168_s16, %s164_s2 }
   0x9   :  { %p171_p3 = por %p170_p2, %p169_p1 }
   0xb   :  { %v118_v34 = vld [vmem:[#allocation2] sm:$0x1]  ;;  %p172_p4 = pnand %p171_p3, %p165_p0 }
  0x1a   :  { %86 = vperm.xlu0 %157, %v71_v3  }
  0x91   :  { %v76_v4 = vpop.xlane.xlu0 %75 }
  0x92   :  { %v77_v5 = vsub.f32 %v70_v0, %v76_v4 }
  0x94   :  { %v78_v6 = vmul.f32 1.442695, %v77_v5 }
  0x96   :  { %158 = vpow2.f32 %v78_v6 }
  0x99   :  { %v87_v9 = vpop.permute.xlu0 %86 }
  0x9a   :  { %vm88_vm1 = vcmp.eq.s32.totalorder %v84_v8, %v87_v9 }
  0x9b   :  { %v89_v14 = vsel %vm88_vm1, %v77_v5, 0.0 }
  0x9c   :  { %v90_v15 = vsel %vm73_vm0, %v89_v14, 0.0 }
  0xa0   :  { %v159_v10 = vpop.eup %158 }
  0xa1   :  { %v80_v11 = vsel %vm73_vm0, %v159_v10, 0.0  ;;  %v93_v12 = vsel %vm88_vm1, %v159_v10, 0.0 }
  0xa2   :  { %81 = vadd.xlane.f32.xlu1 %v80_v11  ;;  %v94_v13 = vsel %vm73_vm0, %v93_v12, 0.0 }
  0xa6   :  { %95 = vadd.xlane.f32.xlu1 %v94_v13 }
  0xaa   :  { %91 = vadd.xlane.f32.xlu1 %v90_v15 }
 0x12f   :  { %v82_v17 = vpop.xlane.xlu1 %81 }
 0x130   :  { %160 = vlog2.f32 %v82_v17 }
 0x131   :  { %162 = vrcp.f32 %v82_v17 }
 0x133   :  { %v96_v20 = vpop.xlane.xlu1 %95 }
 0x137   :  { %v92_v25 = vpop.xlane.xlu1 %91 }
 0x13a   :  { %v161_v18 = vpop.eup %160 }
 0x13b   :  { %v163_v19 = vpop.eup %162  ;;  %v98_v23 = vmul.f32 0.6931472, %v161_v18 }
 0x13c   :  { %v101_v21 = vmul.f32 %v163_v19, %v96_v20 }
 0x13d   :  { %v99_v27 = vsub.f32 %v98_v23, %v92_v25 }
 0x13e   :  { %v102_v22 = vsub.f32 1.0, %v101_v21 }
 0x140   :  { %v103_v24 = vmax.f32 %v102_v22, 0.0 }
 0x142   :  { %v104_v26 = vmul.f32 %v103_v24, %v103_v24 }
 0x144   :  { %v105_v28 = vmul.f32 %v104_v26, %v99_v27 }
 0x146   :  { %v119_v29 = vrot.slane %v105_v28, 4 }
 0x148   :  { %v120_v30 = vadd.f32 %v119_v29, %v105_v28 }
 0x14a   :  { %v121_v31 = vrot.slane %v120_v30, 2 }
 0x14c   :  { %v122_v32 = vadd.f32 %v121_v31, %v120_v30 }
 0x14e   :  { %v123_v33 = vrot.slane %v122_v32, 1 }
 0x150   :  { %v124_v35 = vadd.f32 %v123_v33, %v122_v32 }
 0x152   :  { %v125_v36 = vadd.f32 %v124_v35, %v118_v34 }
 0x154   :  { %127 = vst.msk [vmem:[#allocation2] sm:$0x1] %vm116_vm2, %v125_v36 }
 0x155   :  { %175 = shalt.err (!%p172_p4)
}
 0x156   :  { %s176_s19 = scalar_lea.hbm %s238_s3, 16 }
 0x157   :  { %p177_p5 = scmp.ne.s32.totalorder %s238_s3, %s176_s19  ;;  %p180_p6 = scmp.lt.u32.totalorder %s176_s19, %s238_s3 }
 0x159   :  { %p182_p7 = pnand %p180_p6, %p177_p5 }
 0x15b   :  { %185 = shalt.err (!%p182_p7)
}
 0x15c   :  { %137 = dma.vmem_to_hbm [thread:$0]  %s135_s1, 16, %s238_s3, [#allocation3]  }
 0x15d   :  { %186 = dma.done.wait [#allocation3], 16  }
 0x15e   :  { %187 = vsyncadd [#allocation3], 4294967280 }
 0x15f   :  { %141 = vsyncpa [#allocation3], 1 }

</bundles_post_ra>
